<compile_context>
chip_gen: v7x
topology: tpu7x:2x2x1
jax: 0.10.0
libtpu: 0.0.40
codegen_flags: <defaults>
</compile_context>

<pallas_src>
import functools

import jax
import jax.numpy as jnp
from jax.experimental import pallas as pl
from jax.experimental.pallas import tpu as pltpu


def _round_up(x, m):
    return ((x + m - 1) // m) * m


def _svd_embed_kernel(src_ref, wt_ref, we_ref, bias_ref, out_ref, h_ref):
    # src:  (TILE_B, input_dim)   activation tile (indexed by i)
    # wt:   (input_dim, rank)     VMEM-resident (constant index map)
    # we:   (rank, TILE_N)        streamed over the num axis (indexed by j)
    # bias: (1, TILE_N)           folded (b_embedding + bias), f32
    # out:  (TILE_B, TILE_N)
    # h:    (TILE_B, rank)        f32 scratch, persists across the num axis
    j = pl.program_id(1)

    @pl.when(j == 0)
    def _():
        # Tiny first matmul: computed once per B-tile, reused for all num tiles.
        s = src_ref[...].astype(wt_ref.dtype)
        h_ref[...] = jnp.dot(s, wt_ref[...], preferred_element_type=jnp.float32)

    h = h_ref[...].astype(we_ref.dtype)
    logits = jnp.dot(h, we_ref[...], preferred_element_type=jnp.float32)
    out_ref[...] = (logits + bias_ref[...]).astype(out_ref.dtype)


def prepare_params(w_transformer, w_embedding, b_embedding, bias,
                   *, weight_dtype=jnp.bfloat16):
    """One-time parameter preparation (call once, NOT per forward).

    Args:
      w_transformer: (rank, input_dim)  PyTorch Linear weight layout
      w_embedding:   (num, rank)        PyTorch Linear weight layout
      b_embedding:   (num,)
      bias:          (num,)
    Returns:
      wt (input_dim, rank) weight_dtype, we (rank, num_pad) weight_dtype,
      bias_total (1, num_pad) f32, num (python int).
    """
    rank, input_dim = w_transformer.shape
    num = int(w_embedding.shape[0])
    num_pad = _round_up(num, 128)

    wt = jnp.transpose(w_transformer).astype(weight_dtype)        # (input_dim, rank)
    we = jnp.transpose(w_embedding).astype(weight_dtype)          # (rank, num)
    we = jnp.pad(we, ((0, 0), (0, num_pad - num)))
    bias_total = b_embedding.astype(jnp.float32) + bias.astype(jnp.float32)
    bias_total = jnp.pad(bias_total, (0, num_pad - num)).reshape(1, num_pad)
    return wt, we, bias_total, num


@functools.partial(jax.jit, static_argnames=("num", "tile_b", "tile_n"))
def svd_embedding_classifier(src, wt, we, bias_total, *, num,
                             tile_b=256, tile_n=512):
    """Pallas forward: (B, input_dim) -> (B, num)."""
    B, input_dim = src.shape
    rank = wt.shape[1]
    num_pad = we.shape[1]

    # --- tile sizing (divisibility + conservative VMEM footprint) ---
    tile_b = min(tile_b, _round_up(B, 8))         # multiple of 8 sublanes
    b_pad = _round_up(B, tile_b)
    if num_pad % tile_n:                          # keep lane dim a 128-multiple
        tile_n = 256 if num_pad % 256 == 0 else 128

    src_p = src if b_pad == B else jnp.pad(src, ((0, b_pad - B), (0, 0)))

    grid = (b_pad // tile_b, num_pad // tile_n)

    flops = 2 * b_pad * input_dim * rank + 2 * b_pad * rank * num_pad
    bytes_accessed = (src_p.size * src_p.dtype.itemsize
                      + wt.size * wt.dtype.itemsize
                      + we.size * we.dtype.itemsize
                      + bias_total.size * bias_total.dtype.itemsize
                      + b_pad * num_pad * 4)

    out = pl.pallas_call(
        _svd_embed_kernel,
        out_shape=jax.ShapeDtypeStruct((b_pad, num_pad), jnp.float32),
        grid=grid,
        in_specs=[
            pl.BlockSpec((tile_b, input_dim), lambda i, j: (i, 0)),
            pl.BlockSpec((input_dim, rank), lambda i, j: (0, 0)),
            pl.BlockSpec((rank, tile_n), lambda i, j: (0, j)),
            pl.BlockSpec((1, tile_n), lambda i, j: (0, j)),
        ],
        out_specs=pl.BlockSpec((tile_b, tile_n), lambda i, j: (i, j)),
        scratch_shapes=[pltpu.VMEM((tile_b, rank), jnp.float32)],
        compiler_params=pltpu.CompilerParams(
            dimension_semantics=("parallel", "arbitrary")),
        cost_estimate=pl.CostEstimate(
            flops=flops, transcendentals=0, bytes_accessed=bytes_accessed),
    )(src_p, wt, we, bias_total)

    return out[:B, :num]


def init_params(key, num, rank, input_dim):
    """Deterministic parameter init mirroring the module's init_weights()."""
    k_emb, k_tr, k_bias, k_be = jax.random.split(key, 4)
    # embedding_initializer = nn.init.normal_ (std=1.0)
    w_embedding = jax.random.normal(k_emb, (num, rank), dtype=jnp.float32)
    # transformer_initializer = nn.init.xavier_uniform_
    limit = jnp.sqrt(6.0 / (rank + input_dim))
    w_transformer = jax.random.uniform(
        k_tr, (rank, input_dim), minval=-limit, maxval=limit, dtype=jnp.float32)
    # bias_initializer = nn.init.uniform_ (U[0,1))
    bias = jax.random.uniform(k_bias, (num,), dtype=jnp.float32)
    # nn.Linear default bias init: U[-1/sqrt(rank), 1/sqrt(rank))
    bound = 1.0 / jnp.sqrt(jnp.float32(rank))
    b_embedding = jax.random.uniform(
        k_be, (num,), minval=-bound, maxval=bound, dtype=jnp.float32)
    return w_transformer, w_embedding, b_embedding, bias


if __name__ == "__main__":
    key = jax.random.PRNGKey(0)
    k_src, k_params = jax.random.split(key)

    B, input_dim, rank, num = 8, 32, 16, 64
    src = jax.random.normal(k_src, (B, input_dim), dtype=jnp.float32)
    w_transformer, w_embedding, b_embedding, bias = init_params(
        k_params, num, rank, input_dim)

    # One-time prep: transpose + bf16 cast + num->128 pad + bias fold.
    wt, we, bias_total, num_out = prepare_params(
        w_transformer, w_embedding, b_embedding, bias,
        weight_dtype=jnp.bfloat16)

    out = svd_embedding_classifier(src, wt, we, bias_total, num=num_out)
    jax.block_until_ready(out)

    # Reference using the SAME bf16-rounded weights/activations the kernel sees
    # (bf16 MXU inputs, f32 accumulation), so the comparison is apples-to-apples.
    src_b = src.astype(jnp.bfloat16).astype(jnp.float32)
    wt_f = wt.astype(jnp.float32)                # (input_dim, rank)
    we_f = we[:, :num].astype(jnp.float32)       # (rank, num)
    h_ref = (src_b @ wt_f).astype(jnp.bfloat16).astype(jnp.float32)
    ref = h_ref @ we_f + b_embedding + bias

    assert out.shape == (B, num)
    assert jnp.allclose(out, ref, atol=1e-2, rtol=1e-2), "mismatch vs reference"

    print("KERNEL_OK")
</pallas_src>

<mosaic_0001>
module attributes {stable_mosaic.version = 11 : i64} {
  func.func @_svd_embed_kernel(%arg0: i32, %arg1: i32, %arg2: memref<8x32xf32, #tpu.memory_space<vmem>>, %arg3: memref<32x16xbf16, #tpu.memory_space<vmem>>, %arg4: memref<16x128xbf16, #tpu.memory_space<vmem>>, %arg5: memref<1x128xf32, #tpu.memory_space<vmem>>, %arg6: memref<8x128xf32, #tpu.memory_space<vmem>>, %arg7: memref<8x16xf32, #tpu.memory_space<vmem>>) attributes {dimension_semantics = [#tpu.dimension_semantics<parallel>, #tpu.dimension_semantics<arbitrary>], iteration_bounds = array<i64: 1, 1>, scalar_prefetch = 0 : i64, scratch_operands = 1 : i64, tpu.core_type = #tpu.core_type<tc>, window_params = [{transform_indices = @transform_0, window_bounds = array<i64: 8, 32>}, {pipeline_mode = #tpu.pipeline_mode<synchronous>, transform_indices = @transform_1, window_bounds = array<i64: 32, 16>}, {transform_indices = @transform_2, window_bounds = array<i64: 16, 128>}, {transform_indices = @transform_3, window_bounds = array<i64: 1, 128>}, {transform_indices = @transform_4, window_bounds = array<i64: 8, 128>}]} {
    %c0_i32 = arith.constant 0 : i32
    %0 = arith.cmpi eq, %arg1, %c0_i32 : i32
    %1 = arith.extui %0 : i1 to i32
    %c0_i32_0 = arith.constant 0 : i32
    %2 = arith.cmpi ne, %1, %c0_i32_0 : i32
    scf.if %2 {
      %c0_8 = arith.constant 0 : index
      %c0_9 = arith.constant 0 : index
      %11 = vector.load %arg2[%c0_8, %c0_9] : memref<8x32xf32, #tpu.memory_space<vmem>>, vector<8x32xf32>
      %12 = arith.truncf %11 : vector<8x32xf32> to vector<8x32xbf16>
      %c0_10 = arith.constant 0 : index
      %c0_11 = arith.constant 0 : index
      %13 = vector.load %arg3[%c0_10, %c0_11] : memref<32x16xbf16, #tpu.memory_space<vmem>>, vector<32x16xbf16>
      %cst_12 = arith.constant dense<0.000000e+00> : vector<8x16xf32>
      %14 = tpu.matmul %12, %13, %cst_12 {dimension_numbers = #tpu.dot_dimension_numbers<[1], [0], [0], [1], [0, 0, 1, 1], [], []>} : vector<8x32xbf16>, vector<32x16xbf16>, vector<8x16xf32> -> vector<8x16xf32>
      %c0_13 = arith.constant 0 : index
      %c0_14 = arith.constant 0 : index
      %15 = vector.load %arg7[%c0_13, %c0_14] : memref<8x16xf32, #tpu.memory_space<vmem>>, vector<8x16xf32>
      tpu.vector_store %arg7[%c0_13, %c0_14], %14 {strides = array<i32>} : memref<8x16xf32, #tpu.memory_space<vmem>>, vector<8x16xf32>,
    } else {
    }
    %c0 = arith.constant 0 : index
    %c0_1 = arith.constant 0 : index
    %3 = vector.load %arg7[%c0, %c0_1] : memref<8x16xf32, #tpu.memory_space<vmem>>, vector<8x16xf32>
    %4 = arith.truncf %3 : vector<8x16xf32> to vector<8x16xbf16>
    %c0_2 = arith.constant 0 : index
    %c0_3 = arith.constant 0 : index
    %5 = vector.load %arg4[%c0_2, %c0_3] : memref<16x128xbf16, #tpu.memory_space<vmem>>, vector<16x128xbf16>
    %cst = arith.constant dense<0.000000e+00> : vector<8x128xf32>
    %6 = tpu.matmul %4, %5, %cst {dimension_numbers = #tpu.dot_dimension_numbers<[1], [0], [0], [1], [0, 0, 1, 1], [], []>} : vector<8x16xbf16>, vector<16x128xbf16>, vector<8x128xf32> -> vector<8x128xf32>
    %c0_4 = arith.constant 0 : index
    %c0_5 = arith.constant 0 : index
    %7 = vector.load %arg5[%c0_4, %c0_5] : memref<1x128xf32, #tpu.memory_space<vmem>>, vector<1x128xf32>
    %8 = vector.broadcast %7 : vector<1x128xf32> to vector<8x128xf32>
    %9 = arith.addf %6, %8 : vector<8x128xf32>
    %c0_6 = arith.constant 0 : index
    %c0_7 = arith.constant 0 : index
    %10 = vector.load %arg6[%c0_6, %c0_7] : memref<8x128xf32, #tpu.memory_space<vmem>>, vector<8x128xf32>
    tpu.vector_store %arg6[%c0_6, %c0_7], %9 {strides = array<i32>} : memref<8x128xf32, #tpu.memory_space<vmem>>, vector<8x128xf32>,
    return
  }
  func.func @transform_0(%arg0: i32, %arg1: i32) -> (i32, i32) {
    %c0_i32 = arith.constant 0 : i32
    %c0_i32_0 = arith.constant 0 : i32
    return %arg0, %c0_i32 : i32, i32
  }
  func.func @transform_1(%arg0: i32, %arg1: i32) -> (i32, i32) {
    %c0_i32 = arith.constant 0 : i32
    %c0_i32_0 = arith.constant 0 : i32
    %c0_i32_1 = arith.constant 0 : i32
    return %c0_i32, %c0_i32_0 : i32, i32
  }
  func.func @transform_2(%arg0: i32, %arg1: i32) -> (i32, i32) {
    %c0_i32 = arith.constant 0 : i32
    %c0_i32_0 = arith.constant 0 : i32
    return %c0_i32, %arg1 : i32, i32
  }
  func.func @transform_3(%arg0: i32, %arg1: i32) -> (i32, i32) {
    %c0_i32 = arith.constant 0 : i32
    %c0_i32_0 = arith.constant 0 : i32
    return %c0_i32, %arg1 : i32, i32
  }
  func.func @transform_4(%arg0: i32, %arg1: i32) -> (i32, i32) {
    %c0_i32 = arith.constant 0 : i32
    return %arg0, %arg1 : i32, i32
  }
}

</mosaic_0001>

<bundles_post_ra>
// kernel: svd_embedding_classifier.1
= control target key start
LH: loop header
LB: loop body
LE: loop exit
PB: predicated region body
PF: predicated region fallthrough
CT: control target
= control target key end

     0   :  { %v218_v1 = vmov 0.0   ;;  %vm219_vm0 = vmmov 0   ;;  %s273_s0 = inlined_call_operand.vmem [shape: f32[8,32], index: 0, kind: input, shape index: {}]   ;;  %s274_s1 = inlined_call_operand.vmem [shape: bf16[32,16], index: 1, kind: input, shape index: {}]   ;;  %s275_s2 = inlined_call_operand.vmem [shape: bf16[16,128], index: 2, kind: input, shape index: {}]   ;;  %s276_s3 = inlined_call_operand.vmem [shape: f32[1,128], index: 3, kind: input, shape index: {}]   ;;  %s277_s4 = inlined_call_operand.hbm [shape: f32[8,128], index: 4, kind: output, shape index: {}]  }
   0x1   :  { %v191_v0 = vld [vmem:[%s274_s1] sm:$0xff]   ;;  %174 = vmatprep.subr.bf16.mxu0 %v218_v1  ;;  %v192_v2 = vld [vmem:[%s274_s1 + $0x8] sm:$0xff]   ;;  %182 = vmatprep.subr.bf16.mxu1 %v218_v1 }
   0x2   :  { %175 = vmatpush3.bf16.msra.mxu0 %v191_v0  ;;  %178 = vmatprep.mubr.msk.bf16.mxu0 %vm219_vm0, %v218_v1  ;;  %v23_v3 = vld [vmem:[%s273_s0] sm:$0xff] }
   0x3   :  { %176 = vmatprep.subr.bf16.mxu0 %v218_v1  ;;  %184 = vmatprep.mubr.msk.bf16.mxu1 %vm219_vm0, %v218_v1 }
   0x4   :  { %9 = vsyncpa [#allocation4], 0  ;;  %v24_v4 = vpack.c.bf16 %v23_v3, %v23_v3  ;;  %vm41_vm1 = vcmask 261120   ;;  %v193_v5 = vld [vmem:[%s275_s2] sm:$0xff]   ;;  %vm85_vm2 = vcmask 130048   ;;  %s220_s23 = smov [#allocation3]  }
   0x5   :  { %183 = vmatpush3.bf16.msra.mxu1 %v193_v5  ;;  %v166_v12 = vld [vmem:[%s276_s3] ss:$0 sm:$0xff]  ;;  %s155_s24 = sshll.u32 %s220_s23, 4  ;;  %s156_s24 = int_to_ptr.vmem [resolvable:$true] %s155_s24 }
   0x6   :  { %177 = vmatpush3.bf16.msra.mxu0 %v192_v2  ;;  %s194_s2 = scalar_lea.vmem %s156_s24, 128  ;;  %p199_p1 = scmp.lt.s32.totalorder %s156_s24, %s156_s24 }
   0x7   :  { %p195_p0 = scmp.ne.s32.totalorder %s156_s24, %s194_s2  ;;  %p200_p2 = scmp.lt.s32.totalorder %s194_s2, %s194_s2 }
   0x9   :  { %179 = vmatmul.mubr.msk.bf16.vlgmr.msra.gmra.mrb[0].mxu0 %vm41_vm1, %v24_v4  ;;  %p201_p3 = por %p200_p2, %p199_p1 }
   0xb   :  { %p202_p4 = pnand %p201_p3, %p195_p0 }
  0xdc   :  { %v79_v6 = vpop.f32.mrb[0].mxu0 }
  0xdd   :  { %86 = vst.msk [vmem:[#allocation2] sm:$0xff] %vm85_vm2, %v79_v6  ;;  %v180_v7 = vpop.f32.mrb[1].mxu0 }
  0xde   :  { %v82_v8 = vpop.f32.mrb[2].mxu0 }
  0xdf   :  { %v181_v9 = vpop.f32.mrb[3].mxu0 }
  0xe4   :  { %v87_v10 = vld [vmem:[#allocation2] sm:$0xff] }
  0xe5   :  { %v88_v11 = vpack.c.bf16 %v87_v10, %v87_v10 }
  0xe7   :  { %185 = vmatmul.mubr.msk.bf16.vlgmr.msra.gmra.mrb[0].mxu1 %vm85_vm2, %v88_v11 }
 0x1ba   :  { %v142_v13 = vpop.f32.mrb[0].mxu1 }
 0x1bb   :  { %v143_v14 = vadd.f32 %v166_v12, %v142_v13  ;;  %v186_v15 = vpop.f32.mrb[1].mxu1 }
 0x1bc   :  { %v145_v16 = vpop.f32.mrb[2].mxu1 }
 0x1bd   :  { %148 = vst [vmem:[#allocation3] sm:$0xff] %v143_v14  ;;  %v187_v17 = vpop.f32.mrb[3].mxu1 }
 0x1be   :  { %205 = shalt.err (!%p202_p4)
}
 0x1bf   :  { %s206_s3 = scalar_lea.hbm %s277_s4, 128 }
 0x1c0   :  { %p207_p5 = scmp.ne.s32.totalorder %s277_s4, %s206_s3  ;;  %p210_p6 = scmp.lt.u32.totalorder %s206_s3, %s277_s4 }
 0x1c2   :  { %p212_p7 = pnand %p210_p6, %p207_p5 }
 0x1c4   :  { %215 = shalt.err (!%p212_p7)
}
 0x1c5   :  { %158 = dma.vmem_to_hbm [thread:$0]  %s156_s24, 128, %s277_s4, [#allocation4]  }
 0x1c6   :  { %216 = dma.done.wait [#allocation4], 128  }
 0x1c7   :  { %217 = vsyncadd [#allocation4], 4294967168 }
 0x1c8   :  { %162 = vsyncpa [#allocation4], 1 }

</bundles_post_ra>
